<compile_context>
chip_gen: v5e
topology: v5e:2x2
jax: 0.10.0
libtpu: 0.0.40
codegen_flags: <defaults>
</compile_context>

<pallas_src>
import jax
import jax.numpy as jnp
from jax.experimental import pallas as pl
from jax.experimental.pallas import tpu as pltpu


def _leaky_relu(x, slope=0.01):
    return jnp.where(x >= 0, x, slope * x)


def att_module_kernel(img_ref, ques_ref, w_ref, b_ref, watt_ref, out_ref):
    """One grid step == `block_b` batch elements; everything fits in VMEM."""
    Bt, P, Fi = img_ref.shape
    _, R, Fq = ques_ref.shape
    H = watt_ref.shape[1]

    img = img_ref[...].reshape(Bt * P, Fi)     # (Bt*P, Fi)  leading merge only
    ques = ques_ref[...].reshape(Bt * R, Fq)   # (Bt*R, Fq)

    # ---- Both GatedTrans embeds as ONE block-diagonal matmul ----------------
    # x = [[img | 0], [0 | ques]] (Bt*(P+R), Fi+Fq);  w = [[Wv, 0], [0, Wq]]
    x = jnp.concatenate(
        [jnp.concatenate([img, jnp.zeros((Bt * P, Fq), img.dtype)], axis=1),
         jnp.concatenate([jnp.zeros((Bt * R, Fi), ques.dtype), ques], axis=1)],
        axis=0)
    z = jnp.dot(x, w_ref[...], preferred_element_type=jnp.float32) + b_ref[...]
    zv = z[:Bt * P, :2 * H]                    # img rows, V-embed gate pair
    zq = z[Bt * P:, 2 * H:]                    # ques rows, Q-embed gate pair
    v = jnp.tanh(zv[:, :H]) * _leaky_relu(zv[:, H:])     # (Bt*P, H)
    q = jnp.tanh(zq[:, :H]) * _leaky_relu(zq[:, H:])     # (Bt*R, H)

    # ---- Fused numerator / squared-norm batched matmul ----------------------
    watt = watt_ref[...]                                  # (1, H)
    lhs = jnp.concatenate([q * watt, q * q], axis=1).reshape(Bt, R, 2 * H)
    v3 = v.reshape(Bt, P, H)
    vv = (v * v).reshape(Bt, P, H)
    zeros_p = jnp.zeros_like(v3)
    rhs = jnp.concatenate(
        [jnp.concatenate([v3, zeros_p], axis=2),
         jnp.concatenate([zeros_p, vv], axis=2)], axis=1)  # (Bt, 2P, 2H)
    sc = jnp.einsum("brk,bpk->brp", lhs, rhs,
                    preferred_element_type=jnp.float32)    # (Bt, R, 2P)
    num = sc[..., :P]
    ssq = sc[..., P:]

    # score[b,r,p] = watt . normalize(q_br * v_bp)  (att bias dropped: softmax
    # is shift-invariant over the proposal axis).
    inv_norm = jax.lax.rsqrt(jnp.maximum(ssq, 1e-24))  # == 1/max(||q*v||, 1e-12)
    score = num * inv_norm

    # stable softmax over proposals
    m = jnp.max(score, axis=-1, keepdims=True)
    e = jnp.exp(score - m)
    denom = jnp.sum(e, axis=-1, keepdims=True)
    att = e * pl.reciprocal(denom, approx=False)           # (Bt, R, P)

    # Lane-dense store: pack rounds along lanes -> (Bt, R*P) dense block.
    packed = jnp.concatenate([att[:, r, :] for r in range(R)], axis=1)
    out_ref[...] = packed


def _pick_block_b(B, bytes_per_elem, budget):
    """Largest batch block that divides B, fits `budget`, and keeps the 2-D
    lane-dense output block legal (block == B or block % 8 == 0).  Whole-batch
    (grid = 1) is preferred: each grid step carries ~0.35us pipeline overhead
    and this kernel is overhead/DMA bound.  On v7x pass an explicit block_b
    (e.g. B // 2) if you want both TensorCores busy."""
    if B * bytes_per_elem <= budget:
        return B
    fits = [d for d in range(1, B + 1)
            if B % d == 0 and (d == B or d % 8 == 0)
            and d * bytes_per_elem <= budget]
    if fits:
        return max(fits)
    legal = [d for d in range(1, B + 1) if B % d == 0 and (d == B or d % 8 == 0)]
    return min(legal)


def att_module_pallas(img, ques, params, block_b=None):
    """img: (B, P, Fi) f32; ques: (B, R, Fq) f32 -> att (B, R, P) f32."""
    B, P, Fi = img.shape
    _, R, Fq = ques.shape
    H = params["wvy"].shape[1]

    # Block-diagonal fused GatedTrans weight/bias (built once in the wrapper).
    wv = jnp.concatenate([params["wvy"], params["wvg"]], axis=1)       # (Fi, 2H)
    wq = jnp.concatenate([params["wqy"], params["wqg"]], axis=1)       # (Fq, 2H)
    w = jnp.zeros((Fi + Fq, 4 * H), jnp.float32)
    w = w.at[:Fi, :2 * H].set(wv)
    w = w.at[Fi:, 2 * H:].set(wq)
    b = jnp.concatenate([params["bvy"], params["bvg"],
                         params["bqy"], params["bqg"]], axis=1)        # (1, 4H)
    watt_t = params["watt"].T                                          # (1, H)
    # NOTE: params["batt"] (scalar bias before the softmax) is a per-row
    # constant shift -> mathematically a no-op under softmax, so it is not
    # passed to the kernel at all.

    # VMEM budgeting: default scoped VMEM is 32 MiB (v6e/v7x); keep room for
    # the (double-buffered) weights + compiler scratch, halve again for the
    # input double-buffer.
    weight_bytes = 4 * ((Fi + Fq) * 4 * H + 4 * H + H)
    io_bytes_per_b = 4 * (P * Fi + R * Fq + R * P)
    budget = max(((24 << 20) - 2 * weight_bytes) // 2, 1 << 20)
    if block_b is None:
        block_b = _pick_block_b(B, io_bytes_per_b, budget)
    assert B % block_b == 0, "block_b must divide the batch size"
    grid = (B // block_b,)

    rep = lambda i: (0, 0)  # weights resident across the whole grid

    grid_spec = pltpu.PrefetchScalarGridSpec(
        num_scalar_prefetch=0,
        grid=grid,
        in_specs=[
            pl.BlockSpec((block_b, P, Fi), lambda i: (i, 0, 0)),
            pl.BlockSpec((block_b, R, Fq), lambda i: (i, 0, 0)),
            pl.BlockSpec((Fi + Fq, 4 * H), rep),
            pl.BlockSpec((1, 4 * H), rep),
            pl.BlockSpec((1, H), rep),
        ],
        out_specs=pl.BlockSpec((block_b, R * P), lambda i: (i, 0)),
    )

    # Only raise the scoped-VMEM limit when the working set actually needs it
    # (keeps v7x's 64 MiB physical budget safe at production feature sizes).
    est_vmem = 2 * (block_b * io_bytes_per_b + weight_bytes) + (2 << 20)
    vmem_limit = min(est_vmem, 60 << 20) if est_vmem > (28 << 20) else None

    out_flat = pl.pallas_call(
        att_module_kernel,
        out_shape=jax.ShapeDtypeStruct((B, R * P), jnp.float32),
        grid_spec=grid_spec,
        compiler_params=pltpu.CompilerParams(
            dimension_semantics=("parallel",),
            vmem_limit_bytes=vmem_limit),
    )(img, ques, w, b, watt_t)

    return out_flat.reshape(B, R, P)


# ------------------------- reference & parameter init -------------------------

def att_module_ref(img, ques, p):
    """Pure-JAX reference mirroring the PyTorch forward (eval mode)."""
    def gated(x, wy, by, wg, bg):
        return jnp.tanh(x @ wy + by) * _leaky_relu(x @ wg + bg)

    B, P, Fi = img.shape
    _, R, Fq = ques.shape
    v = gated(img.reshape(-1, Fi), p["wvy"], p["bvy"], p["wvg"], p["bvg"]).reshape(B, P, -1)
    q = gated(ques.reshape(-1, Fq), p["wqy"], p["bqy"], p["wqg"], p["bqg"]).reshape(B, R, -1)
    prod = q[:, :, None, :] * v[:, None, :, :]                          # (B,R,P,H)
    norm = jnp.sqrt(jnp.sum(prod * prod, axis=-1, keepdims=True))
    normed = prod / jnp.maximum(norm, 1e-12)                            # F.normalize(p=2)
    score = jnp.einsum("brph,ho->brpo", normed, p["watt"])[..., 0] + p["batt"][0, 0]
    return jax.nn.softmax(score, axis=-1)


def kaiming_uniform(key, fan_in, fan_out):
    """nn.init.kaiming_uniform_ on a (out,in) weight -> returned transposed (in,out)."""
    gain = jnp.sqrt(2.0)
    bound = gain * jnp.sqrt(3.0 / fan_in)
    w = jax.random.uniform(key, (fan_out, fan_in), jnp.float32, -bound, bound)
    return w.T  # store as (in, out) so kernel does x @ W


def make_params(key, img_feat, word_emb, hidden):
    ks = jax.random.split(key, 5)
    return {
        "wvy": kaiming_uniform(ks[0], img_feat, hidden), "bvy": jnp.zeros((1, hidden), jnp.float32),
        "wvg": kaiming_uniform(ks[1], img_feat, hidden), "bvg": jnp.zeros((1, hidden), jnp.float32),
        "wqy": kaiming_uniform(ks[2], word_emb, hidden), "bqy": jnp.zeros((1, hidden), jnp.float32),
        "wqg": kaiming_uniform(ks[3], word_emb, hidden), "bqg": jnp.zeros((1, hidden), jnp.float32),
        "watt": kaiming_uniform(ks[4], hidden, 1),       "batt": jnp.zeros((1, 1), jnp.float32),
    }


if __name__ == "__main__":
    # hparams: img_feature_size=64, word_embedding_size=48, lstm_hidden_size=32
    B, R, P = 2, 8, 16
    IMG_FEAT, WORD_EMB, HIDDEN = 64, 48, 32

    key = jax.random.PRNGKey(0)
    k_img, k_ques, k_par = jax.random.split(key, 3)
    img = jax.random.normal(k_img, (B, P, IMG_FEAT), jnp.float32)
    ques = jax.random.normal(k_ques, (B, R, WORD_EMB), jnp.float32)
    params = make_params(k_par, IMG_FEAT, WORD_EMB, HIDDEN)

    out = att_module_pallas(img, ques, params)
    out = jax.block_until_ready(out)

    ref = att_module_ref(img, ques, params)
    assert out.shape == (B, R, P)
    assert jnp.allclose(out, ref, atol=1e-5, rtol=1e-5), "mismatch vs reference"
    assert jnp.allclose(jnp.sum(out, axis=-1), 1.0, atol=1e-5), "softmax rows must sum to 1"

    print("KERNEL_OK")
</pallas_src>

<mosaic_0001>
module attributes {stable_mosaic.version = 11 : i64} {
  func.func @att_module_kernel(%arg0: i32, %arg1: memref<2x16x64xf32, #tpu.memory_space<vmem>>, %arg2: memref<2x8x48xf32, #tpu.memory_space<vmem>>, %arg3: memref<112x128xf32, #tpu.memory_space<vmem>>, %arg4: memref<1x128xf32, #tpu.memory_space<vmem>>, %arg5: memref<1x32xf32, #tpu.memory_space<vmem>>, %arg6: memref<2x128xf32, #tpu.memory_space<vmem>>) attributes {dimension_semantics = [#tpu.dimension_semantics<parallel>], iteration_bounds = array<i64: 1>, scalar_prefetch = 0 : i64, scratch_operands = 0 : i64, tpu.core_type = #tpu.core_type<tc>, window_params = [{transform_indices = @transform_0, window_bounds = array<i64: 2, 16, 64>}, {transform_indices = @transform_1, window_bounds = array<i64: 2, 8, 48>}, {pipeline_mode = #tpu.pipeline_mode<synchronous>, transform_indices = @transform_2, window_bounds = array<i64: 112, 128>}, {pipeline_mode = #tpu.pipeline_mode<synchronous>, transform_indices = @transform_3, window_bounds = array<i64: 1, 128>}, {pipeline_mode = #tpu.pipeline_mode<synchronous>, transform_indices = @transform_4, window_bounds = array<i64: 1, 32>}, {transform_indices = @transform_5, window_bounds = array<i64: 2, 128>}]} {
    %c0 = arith.constant 0 : index
    %c0_0 = arith.constant 0 : index
    %c0_1 = arith.constant 0 : index
    %0 = vector.load %arg1[%c0, %c0_0, %c0_1] : memref<2x16x64xf32, #tpu.memory_space<vmem>>, vector<2x16x64xf32>
    %1 = vector.shape_cast %0 : vector<2x16x64xf32> to vector<32x64xf32>
    %c0_2 = arith.constant 0 : index
    %c0_3 = arith.constant 0 : index
    %c0_4 = arith.constant 0 : index
    %2 = vector.load %arg2[%c0_2, %c0_3, %c0_4] : memref<2x8x48xf32, #tpu.memory_space<vmem>>, vector<2x8x48xf32>
    %3 = vector.shape_cast %2 : vector<2x8x48xf32> to vector<16x48xf32>
    %cst = arith.constant 0.000000e+00 : f32
    %4 = vector.broadcast %cst : f32 to vector<32x48xf32>
    %5 = tpu.concatenate %1, %4 in 1 : vector<32x64xf32>, vector<32x48xf32> -> vector<32x112xf32>
    %cst_5 = arith.constant 0.000000e+00 : f32
    %6 = vector.broadcast %cst_5 : f32 to vector<16x64xf32>
    %7 = tpu.concatenate %6, %3 in 1 : vector<16x64xf32>, vector<16x48xf32> -> vector<16x112xf32>
    %8 = tpu.concatenate %5, %7 in 0 : vector<32x112xf32>, vector<16x112xf32> -> vector<48x112xf32>
    %c0_6 = arith.constant 0 : index
    %c0_7 = arith.constant 0 : index
    %9 = vector.load %arg3[%c0_6, %c0_7] : memref<112x128xf32, #tpu.memory_space<vmem>>, vector<112x128xf32>
    %cst_8 = arith.constant dense<0.000000e+00> : vector<48x128xf32>
    %10 = tpu.matmul %8, %9, %cst_8 {dimension_numbers = #tpu.dot_dimension_numbers<[1], [0], [0], [1], [0, 0, 1, 1], [], []>} : vector<48x112xf32>, vector<112x128xf32>, vector<48x128xf32> -> vector<48x128xf32>
    %c0_9 = arith.constant 0 : index
    %c0_10 = arith.constant 0 : index
    %11 = vector.load %arg4[%c0_9, %c0_10] : memref<1x128xf32, #tpu.memory_space<vmem>>, vector<1x128xf32>
    %12 = vector.broadcast %11 : vector<1x128xf32> to vector<48x128xf32>
    %13 = arith.addf %10, %12 : vector<48x128xf32>
    %14 = vector.extract_strided_slice %13 {offsets = [0, 0], sizes = [32, 64], strides = [1, 1]} : vector<48x128xf32> to vector<32x64xf32>
    %15 = vector.extract_strided_slice %13 {offsets = [32, 64], sizes = [16, 64], strides = [1, 1]} : vector<48x128xf32> to vector<16x64xf32>
    %16 = vector.extract_strided_slice %14 {offsets = [0, 0], sizes = [32, 32], strides = [1, 1]} : vector<32x64xf32> to vector<32x32xf32>
    %17 = math.tanh %16 : vector<32x32xf32>
    %18 = vector.extract_strided_slice %14 {offsets = [0, 32], sizes = [32, 32], strides = [1, 1]} : vector<32x64xf32> to vector<32x32xf32>
    %cst_11 = arith.constant 0.000000e+00 : f32
    %19 = vector.broadcast %cst_11 : f32 to vector<32x32xf32>
    %20 = arith.cmpf oge, %18, %19 : vector<32x32xf32>
    %cst_12 = arith.constant 0.00999999977 : f32
    %21 = vector.broadcast %cst_12 : f32 to vector<32x32xf32>
    %22 = arith.mulf %21, %18 : vector<32x32xf32>
    %23 = arith.select %20, %18, %22 : vector<32x32xi1>, vector<32x32xf32>
    %24 = arith.mulf %17, %23 : vector<32x32xf32>
    %25 = vector.extract_strided_slice %15 {offsets = [0, 0], sizes = [16, 32], strides = [1, 1]} : vector<16x64xf32> to vector<16x32xf32>
    %26 = math.tanh %25 : vector<16x32xf32>
    %27 = vector.extract_strided_slice %15 {offsets = [0, 32], sizes = [16, 32], strides = [1, 1]} : vector<16x64xf32> to vector<16x32xf32>
    %cst_13 = arith.constant 0.000000e+00 : f32
    %28 = vector.broadcast %cst_13 : f32 to vector<16x32xf32>
    %29 = arith.cmpf oge, %27, %28 : vector<16x32xf32>
    %cst_14 = arith.constant 0.00999999977 : f32
    %30 = vector.broadcast %cst_14 : f32 to vector<16x32xf32>
    %31 = arith.mulf %30, %27 : vector<16x32xf32>
    %32 = arith.select %29, %27, %31 : vector<16x32xi1>, vector<16x32xf32>
    %33 = arith.mulf %26, %32 : vector<16x32xf32>
    %c0_15 = arith.constant 0 : index
    %c0_16 = arith.constant 0 : index
    %34 = vector.load %arg5[%c0_15, %c0_16] : memref<1x32xf32, #tpu.memory_space<vmem>>, vector<1x32xf32>
    %35 = vector.broadcast %34 : vector<1x32xf32> to vector<16x32xf32>
    %36 = arith.mulf %33, %35 : vector<16x32xf32>
    %37 = arith.mulf %33, %33 : vector<16x32xf32>
    %38 = tpu.concatenate %36, %37 in 1 : vector<16x32xf32>, vector<16x32xf32> -> vector<16x64xf32>
    %39 = vector.shape_cast %38 : vector<16x64xf32> to vector<2x8x64xf32>
    %40 = vector.shape_cast %24 : vector<32x32xf32> to vector<2x16x32xf32>
    %41 = arith.mulf %24, %24 : vector<32x32xf32>
    %42 = vector.shape_cast %41 : vector<32x32xf32> to vector<2x16x32xf32>
    %cst_17 = arith.constant 0.000000e+00 : f32
    %43 = vector.broadcast %cst_17 : f32 to vector<2x16x32xf32>
    %44 = tpu.concatenate %40, %43 in 2 : vector<2x16x32xf32>, vector<2x16x32xf32> -> vector<2x16x64xf32>
    %45 = tpu.concatenate %43, %42 in 2 : vector<2x16x32xf32>, vector<2x16x32xf32> -> vector<2x16x64xf32>
    %46 = tpu.concatenate %44, %45 in 1 : vector<2x16x64xf32>, vector<2x16x64xf32> -> vector<2x32x64xf32>
    "tpu.trace_start"() <{level = 10 : i32, message = "brk,bpk->brp"}> : () -> ()
    %cst_18 = arith.constant dense<0.000000e+00> : vector<2x8x32xf32>
    %47 = tpu.matmul %39, %46, %cst_18 {dimension_numbers = #tpu.dot_dimension_numbers<[2], [2], [1], [1], [0, 0, 0, 1, 1, 1], [0], [0]>} : vector<2x8x64xf32>, vector<2x32x64xf32>, vector<2x8x32xf32> -> vector<2x8x32xf32>
    "tpu.trace_stop"() : () -> ()
    %48 = vector.extract_strided_slice %47 {offsets = [0, 0, 0], sizes = [2, 8, 16], strides = [1, 1, 1]} : vector<2x8x32xf32> to vector<2x8x16xf32>
    %49 = vector.extract_strided_slice %47 {offsets = [0, 0, 16], sizes = [2, 8, 16], strides = [1, 1, 1]} : vector<2x8x32xf32> to vector<2x8x16xf32>
    %cst_19 = arith.constant 1.000000e-24 : f32
    %50 = vector.broadcast %cst_19 : f32 to vector<2x8x16xf32>
    %51 = arith.maximumf %49, %50 : vector<2x8x16xf32>
    %52 = math.rsqrt %51 : vector<2x8x16xf32>
    %53 = arith.mulf %48, %52 : vector<2x8x16xf32>
    %cst_20 = arith.constant dense<0xFF800000> : vector<2x8xf32>
    %54 = vector.multi_reduction <maximumf>, %53, %cst_20 [2] : vector<2x8x16xf32> to vector<2x8xf32>
    %55 = vector.shape_cast %54 : vector<2x8xf32> to vector<2x8x1xf32>
    %56 = vector.broadcast %55 : vector<2x8x1xf32> to vector<2x8x16xf32>
    %57 = arith.subf %53, %56 : vector<2x8x16xf32>
    %58 = math.exp %57 : vector<2x8x16xf32>
    %cst_21 = arith.constant dense<0.000000e+00> : vector<2x8xf32>
    %59 = vector.multi_reduction <add>, %58, %cst_21 [2] : vector<2x8x16xf32> to vector<2x8xf32>
    %60 = vector.shape_cast %59 : vector<2x8xf32> to vector<2x8x1xf32>
    %61 = tpu.reciprocal %60 : vector<2x8x1xf32> -> vector<2x8x1xf32>
    %62 = vector.broadcast %61 : vector<2x8x1xf32> to vector<2x8x16xf32>
    %63 = arith.mulf %58, %62 : vector<2x8x16xf32>
    %64 = vector.extract_strided_slice %63 {offsets = [0, 0, 0], sizes = [2, 1, 16], strides = [1, 1, 1]} : vector<2x8x16xf32> to vector<2x1x16xf32>
    %65 = vector.shape_cast %64 : vector<2x1x16xf32> to vector<2x16xf32>
    %66 = vector.extract_strided_slice %63 {offsets = [0, 1, 0], sizes = [2, 1, 16], strides = [1, 1, 1]} : vector<2x8x16xf32> to vector<2x1x16xf32>
    %67 = vector.shape_cast %66 : vector<2x1x16xf32> to vector<2x16xf32>
    %68 = vector.extract_strided_slice %63 {offsets = [0, 2, 0], sizes = [2, 1, 16], strides = [1, 1, 1]} : vector<2x8x16xf32> to vector<2x1x16xf32>
    %69 = vector.shape_cast %68 : vector<2x1x16xf32> to vector<2x16xf32>
    %70 = vector.extract_strided_slice %63 {offsets = [0, 3, 0], sizes = [2, 1, 16], strides = [1, 1, 1]} : vector<2x8x16xf32> to vector<2x1x16xf32>
    %71 = vector.shape_cast %70 : vector<2x1x16xf32> to vector<2x16xf32>
    %72 = vector.extract_strided_slice %63 {offsets = [0, 4, 0], sizes = [2, 1, 16], strides = [1, 1, 1]} : vector<2x8x16xf32> to vector<2x1x16xf32>
    %73 = vector.shape_cast %72 : vector<2x1x16xf32> to vector<2x16xf32>
    %74 = vector.extract_strided_slice %63 {offsets = [0, 5, 0], sizes = [2, 1, 16], strides = [1, 1, 1]} : vector<2x8x16xf32> to vector<2x1x16xf32>
    %75 = vector.shape_cast %74 : vector<2x1x16xf32> to vector<2x16xf32>
    %76 = vector.extract_strided_slice %63 {offsets = [0, 6, 0], sizes = [2, 1, 16], strides = [1, 1, 1]} : vector<2x8x16xf32> to vector<2x1x16xf32>
    %77 = vector.shape_cast %76 : vector<2x1x16xf32> to vector<2x16xf32>
    %78 = vector.extract_strided_slice %63 {offsets = [0, 7, 0], sizes = [2, 1, 16], strides = [1, 1, 1]} : vector<2x8x16xf32> to vector<2x1x16xf32>
    %79 = vector.shape_cast %78 : vector<2x1x16xf32> to vector<2x16xf32>
    %80 = tpu.concatenate %65, %67, %69, %71, %73, %75, %77, %79 in 1 : vector<2x16xf32>, vector<2x16xf32>, vector<2x16xf32>, vector<2x16xf32>, vector<2x16xf32>, vector<2x16xf32>, vector<2x16xf32>, vector<2x16xf32> -> vector<2x128xf32>
    %c0_22 = arith.constant 0 : index
    %c0_23 = arith.constant 0 : index
    %81 = vector.load %arg6[%c0_22, %c0_23] : memref<2x128xf32, #tpu.memory_space<vmem>>, vector<2x128xf32>
    tpu.vector_store %arg6[%c0_22, %c0_23], %80 {strides = array<i32>} : memref<2x128xf32, #tpu.memory_space<vmem>>, vector<2x128xf32>,
    return
  }
  func.func @transform_0(%arg0: i32) -> (i32, i32, i32) {
    %c0_i32 = arith.constant 0 : i32
    %c0_i32_0 = arith.constant 0 : i32
    %c0_i32_1 = arith.constant 0 : i32
    return %arg0, %c0_i32, %c0_i32_0 : i32, i32, i32
  }
  func.func @transform_1(%arg0: i32) -> (i32, i32, i32) {
    %c0_i32 = arith.constant 0 : i32
    %c0_i32_0 = arith.constant 0 : i32
    %c0_i32_1 = arith.constant 0 : i32
    return %arg0, %c0_i32, %c0_i32_0 : i32, i32, i32
  }
  func.func @transform_2(%arg0: i32) -> (i32, i32) {
    %c0_i32 = arith.constant 0 : i32
    %c0_i32_0 = arith.constant 0 : i32
    %c0_i32_1 = arith.constant 0 : i32
    return %c0_i32, %c0_i32_0 : i32, i32
  }
  func.func @transform_3(%arg0: i32) -> (i32, i32) {
    %c0_i32 = arith.constant 0 : i32
    %c0_i32_0 = arith.constant 0 : i32
    %c0_i32_1 = arith.constant 0 : i32
    return %c0_i32, %c0_i32_0 : i32, i32
  }
  func.func @transform_4(%arg0: i32) -> (i32, i32) {
    %c0_i32 = arith.constant 0 : i32
    %c0_i32_0 = arith.constant 0 : i32
    %c0_i32_1 = arith.constant 0 : i32
    return %c0_i32, %c0_i32_0 : i32, i32
  }
  func.func @transform_5(%arg0: i32) -> (i32, i32) {
    %c0_i32 = arith.constant 0 : i32
    %c0_i32_0 = arith.constant 0 : i32
    return %arg0, %c0_i32 : i32, i32
  }
}

</mosaic_0001>

<bundles_post_ra>
// kernel: tpu_custom_call.1
= control target key start
LH: loop header
LB: loop body
LE: loop exit
PB: predicated region body
PF: predicated region fallthrough
CT: control target
= control target key end

     0   :  { %10 = vsyncpa [#allocation3], 0  ;;  %s816_s0 = inlined_call_operand.hbm [shape: f32[2,16,64], index: 0, kind: input, shape index: {}]   ;;  %s817_s1 = inlined_call_operand.hbm [shape: f32[2,8,48], index: 1, kind: input, shape index: {}]   ;;  %s818_s2 = inlined_call_operand.hbm [shape: f32[112,128], index: 2, kind: input, shape index: {}]   ;;  %s819_s3 = inlined_call_operand.vmem [shape: f32[1,128], index: 3, kind: input, shape index: {}]   ;;  %s820_s4 = inlined_call_operand.vmem [shape: f32[1,32], index: 4, kind: input, shape index: {}]   ;;  %s821_s5 = inlined_call_operand.hbm [shape: f32[2,128], index: 5, kind: output, shape index: {}]  }
   0x1   :  { %11 = vsyncpa [#allocation6], 0 }
   0x2   :  { %12 = vsyncpa [#allocation4], 0  ;;  %s30_s20 = sshll.u32 %s817_s1, 4  ;;  %s684_s21 = smov [#allocation5]   ;;  %s31_s20 = int_to_ptr.hbm [resolvable:$true] %s30_s20 }
   0x3   :  { %s32_s22 = sshll.u32 %s684_s21, 4  ;;  %s17_s25 = sshll.u32 %s816_s0, 4  ;;  %s33_s22 = int_to_ptr.vmem [resolvable:$true] %s32_s22  ;;  %s18_s25 = int_to_ptr.hbm [resolvable:$true] %s17_s25 }
   0x4   :  { %s685_s26 = smov 128   ;;  %s686_s27 = smov 8  }
   0x5   :  { %38 = dma.hbm_to_vmem [thread:$0]  %s31_s20, 256, %s33_s22, [#allocation6], %s685_s26, %s685_s26, %s686_s27  }
   0x6   :  { %s687_s28 = smov [#allocation2]   ;;  %s43_s7 = sshll.u32 %s818_s2, 4  ;;  %s44_s7 = int_to_ptr.hbm [resolvable:$true] %s43_s7 }
   0x7   :  { %s19_s29 = sshll.u32 %s687_s28, 4  ;;  %s688_s1 = smov [#allocation7]   ;;  %s20_s29 = int_to_ptr.vmem [resolvable:$true] %s19_s29 }
   0x8   :  { %25 = dma.hbm_to_vmem [thread:$0]  %s18_s25, 512, %s20_s29, [#allocation3], %s685_s26, %s685_s26, %s686_s27  }
   0x9   :  { %s45_s8 = sshll.u32 %s688_s1, 4  ;;  %s46_s8 = int_to_ptr.vmem [resolvable:$true] %s45_s8 }
   0xa   :  { %51 = dma.hbm_to_vmem [thread:$0]  %s44_s7, 1792, %s46_s8, [#allocation6], %s685_s26, %s685_s26, %s686_s27  }
   0xb   :  { %678 = dma.done.wait [#allocation3], 512  }
   0xc   :  { %679 = vsyncadd [#allocation3], 4294966784 }
   0xd   :  { %680 = dma.done.wait [#allocation6], 2048  }
   0xe   :  { %681 = vsyncadd [#allocation6], 4294965248  ;;  %v102_v0 = vld [vmem:[#allocation7 + $0x68] sm:$0xff]  ;;  %v72_v1 = vld [vmem:[#allocation5] sm:$0xff]  ;;  %s689_s0 = smov 64   ;;  %vm74_vm0 = vcmask 523264  }
   0xf   :  { %v101_v2 = vld [vmem:[#allocation7 + $0x60] sm:$0xff]  ;;  %128 = vmatpush.msra.mxu0 %v102_v0  ;;  %515 = vmatpush.msra.mxu1 %v102_v0  ;;  %v100_v3 = vld [vmem:[#allocation7 + $0x58] sm:$0xff]  ;;  %v99_v4 = vld [vmem:[#allocation7 + $0x50] sm:$0xff]  ;;  %vm107_vm1 = vcmask 916480   ;;  %s690_s10 = smov 96   ;;  %vm241_vm8 = vcmask 261120  }
  0x10   :  { %81 = vrot.lane.b32.xlu0 %v72_v1, %s689_s0  ;;  %516 = vmatpush.msra.mxu3 %v102_v0  ;;  %v98_v5 = vld [vmem:[#allocation7 + $0x48] sm:$0xff]  ;;  %v73_v6 = vld [vmem:[#allocation5 + $0x8] sm:$0xff]  ;;  %v97_v7 = vld [vmem:[#allocation7 + $0x40] sm:$0xff]  ;;  %s692_s12 = smov 112   ;;  %vm374_vm15 = vcmask 130048   ;;  %s693_s13 = smov 16  }
  0x11   :  { %129 = vmatpush.msra.mxu0 %v101_v2  ;;  %517 = vmatpush.msra.mxu1 %v101_v2  ;;  %v96_v8 = vld [vmem:[#allocation7 + $0x38] sm:$0xff]  ;;  %v95_v9 = vld [vmem:[#allocation7 + $0x30] sm:$0xff]  ;;  %v94_v10 = vld [vmem:[#allocation7 + $0x28] sm:$0xff]  ;;  %s694_s14 = smov 48   ;;  %s695_s15 = smov 80  }
  0x12   :  { %518 = vmatpush.msra.mxu3 %v101_v2  ;;  %v93_v11 = vld [vmem:[#allocation7 + $0x20] sm:$0xff]  ;;  %v92_v12 = vld [vmem:[#allocation7 + $0x18] sm:$0xff]  ;;  %v91_v13 = vld [vmem:[#allocation7 + $0x10] sm:$0xff]  ;;  %s696_s16 = smov [#allocation8]   ;;  %s488_s20 = sshll.u32 %s821_s5, 4  ;;  %s489_s20 = int_to_ptr.hbm [resolvable:$true] %s488_s20 }
  0x13   :  { %130 = vmatpush.msra.mxu0 %v100_v3  ;;  %519 = vmatpush.msra.mxu1 %v100_v3  ;;  %v90_v14 = vld [vmem:[#allocation7 + $0x8] sm:$0xff]  ;;  %v68_v15 = vld [vmem:[#allocation2] sm:$0xff]  ;;  %v70_v16 = vld [vmem:[#allocation2 + $0x10] sm:$0xff]  ;;  %s486_s17 = sshll.u32 %s696_s16, 4  ;;  %s487_s17 = int_to_ptr.vmem [resolvable:$true] %s486_s17 }
  0x14   :  { %520 = vmatpush.msra.mxu3 %v100_v3  ;;  %v89_v17 = vld [vmem:[#allocation7] sm:$0xff]  ;;  %v75_v18 = vsel %vm74_vm0, %v68_v15, 0.0  ;;  %v77_v19 = vsel %vm74_vm0, %v70_v16, 0.0  ;;  %v69_v20 = vld [vmem:[#allocation2 + $0x8] sm:$0xff]  ;;  %v71_v21 = vld [vmem:[#allocation2 + $0x18] sm:$0xff] }
  0x15   :  { %131 = vmatpush.msra.mxu0 %v99_v4  ;;  %521 = vmatpush.msra.mxu1 %v99_v4  ;;  %v76_v22 = vsel %vm74_vm0, %v69_v20, 0.0  ;;  %v78_v23 = vsel %vm74_vm0, %v71_v21, 0.0  ;;  %v556_v30 = vld [vmem:[%s819_s3] ss:$0 sm:$0xff] }
  0x16   :  { %522 = vmatpush.msra.mxu3 %v99_v4  ;;  %v557_v45 = vld [vmem:[%s820_s4] ss:$0 sm:$0xff]  ;;  %s691_s4 = smov 32  }
  0x17   :  { %132 = vmatpush.msra.mxu0 %v98_v5  ;;  %523 = vmatpush.msra.mxu1 %v98_v5 }
  0x18   :  { %83 = vrot.lane.b32.xlu0 %v73_v6, %s689_s0  ;;  %524 = vmatpush.msra.mxu3 %v98_v5 }
  0x19   :  { %133 = vmatpush.msra.mxu0 %v97_v7  ;;  %525 = vmatpush.msra.mxu1 %v97_v7 }
  0x1a   :  { %526 = vmatpush.msra.mxu3 %v97_v7 }
  0x1b   :  { %134 = vmatpush.msra.mxu0 %v96_v8  ;;  %527 = vmatpush.msra.mxu1 %v96_v8 }
  0x1c   :  { %528 = vmatpush.msra.mxu3 %v96_v8 }
  0x1d   :  { %135 = vmatpush.msra.mxu0 %v95_v9  ;;  %529 = vmatpush.msra.mxu1 %v95_v9 }
  0x1e   :  { %530 = vmatpush.msra.mxu3 %v95_v9 }
  0x1f   :  { %136 = vmatpush.msra.mxu0 %v94_v10  ;;  %531 = vmatpush.msra.mxu1 %v94_v10 }
  0x20   :  { %532 = vmatpush.msra.mxu3 %v94_v10 }
  0x21   :  { %137 = vmatpush.msra.mxu0 %v93_v11  ;;  %533 = vmatpush.msra.mxu1 %v93_v11 }
  0x22   :  { %534 = vmatpush.msra.mxu3 %v93_v11 }
  0x23   :  { %138 = vmatpush.msra.mxu0 %v92_v12  ;;  %535 = vmatpush.msra.mxu1 %v92_v12 }
  0x24   :  { %536 = vmatpush.msra.mxu3 %v92_v12 }
  0x25   :  { %139 = vmatpush.msra.mxu0 %v91_v13  ;;  %537 = vmatpush.msra.mxu1 %v91_v13 }
  0x26   :  { %538 = vmatpush.msra.mxu3 %v91_v13 }
  0x27   :  { %140 = vmatpush.msra.mxu0 %v90_v14  ;;  %539 = vmatpush.msra.mxu1 %v90_v14 }
  0x28   :  { %540 = vmatpush.msra.mxu3 %v90_v14 }
  0x29   :  { %141 = vmatpush.msra.mxu0 %v89_v17  ;;  %541 = vmatpush.msra.mxu1 %v89_v17 }
  0x2a   :  { %499 = vmatmul.msk.f32.vlgmr.msra.gmra.mxu0 %vm107_vm1, %v75_v18  ;;  %501 = vmatmul.msk.f32.vlgmr.msra.gmra.mxu1 %vm107_vm1, %v77_v19 }
  0x2b   :  { %542 = vmatpush.msra.mxu3 %v89_v17 }
  0x32   :  { %500 = vmatmul.msk.f32.gmra.mxu0 %vm107_vm1, %v76_v22  ;;  %502 = vmatmul.msk.f32.gmra.mxu1 %vm107_vm1, %v78_v23 }
  0x82   :  { %v82_v24 = vpop.permute.xlu0 %81 }
  0x83   :  { %v87_v25 = vsel %vm74_vm0, 0.0, %v82_v24 }
  0x84   :  { %503 = vmatmul.msk.f32.vlgmr.msra.gmra.mxu3 %vm107_vm1, %v87_v25 }
  0x8a   :  { %v84_v26 = vpop.permute.xlu0 %83 }
  0x8b   :  { %v88_v27 = vsel %vm74_vm0, 0.0, %v84_v26 }
  0x8c   :  { %504 = vmatmul.msk.f32.gmra.mxu3 %vm107_vm1, %v88_v27 }
  0xa7   :  { %v143_v28 = vpop.f32.mrf.mxu0  ;;  %v149_v29 = vpop.f32.mrf.mxu1 }
  0xa8   :  { %v144_v35 = vadd.f32 %v556_v30, %v143_v28  ;;  %v150_v36 = vadd.f32 %v556_v30, %v149_v29 }
  0xaa   :  { %v171_v41 = vmul.f32 0.01, %v150_v36  ;;  %v169_v42 = vmul.f32 0.01, %v144_v35  ;;  %vm167_vm4 = vcmp.ge.f32.partialorder %v150_v36, 0.0  ;;  %vm165_vm5 = vcmp.ge.f32.partialorder %v144_v35, 0.0 }
  0xac   :  { %v175_v43 = vsel %vm167_vm4, %v150_v36, %v171_v41  ;;  %v173_v44 = vsel %vm165_vm5, %v144_v35, %v169_v42 }
  0xaf   :  { %v146_v31 = vpop.f32.mrf.mxu0  ;;  %v152_v32 = vpop.f32.mrf.mxu1 }
  0xb0   :  { %v147_v33 = vadd.f32 %v556_v30, %v146_v31  ;;  %v153_v34 = vadd.f32 %v556_v30, %v152_v32 }
  0xb2   :  { %vm168_vm2 = vcmp.ge.f32.partialorder %v153_v34, 0.0  ;;  %v172_v37 = vmul.f32 0.01, %v153_v34  ;;  %vm166_vm3 = vcmp.ge.f32.partialorder %v147_v33, 0.0  ;;  %v170_v38 = vmul.f32 0.01, %v147_v33 }
  0xb3   :  { %558 = vtanh.f32 %v153_v34 }
  0xb4   :  { %v176_v39 = vsel %vm168_vm2, %v153_v34, %v172_v37  ;;  %v174_v40 = vsel %vm166_vm3, %v147_v33, %v170_v38  ;;  %560 = vtanh.f32 %v147_v33 }
  0xb5   :  { %187 = vrot.lane.b32.xlu2 %v176_v39, %s690_s10  ;;  %183 = vrot.lane.b32.xlu1 %v174_v40, %s690_s10  ;;  %562 = vtanh.f32 %v150_v36 }
  0xb6   :  { %564 = vtanh.f32 %v144_v35 }
  0xb9   :  { %v559_v52 = vpop.eup %558 }
  0xba   :  { %v561_v58 = vpop.eup %560 }
  0xbb   :  { %v563_v63 = vpop.eup %562 }
  0xbc   :  { %v565_v1 = vpop.eup %564 }
  0xbd   :  { %185 = vrot.lane.b32.xlu2 %v175_v43, %s690_s10  ;;  %181 = vrot.lane.b32.xlu1 %v173_v44, %s690_s10 }
  0xc5   :  { %218 = vrot.lane.b32.xlu1 %v557_v45, %s689_s0 }
 0x107   :  { %v155_v46 = vpop.f32.mrf.mxu3 }
 0x108   :  { %v156_v47 = vadd.f32 %v556_v30, %v155_v46 }
 0x10a   :  { %vm199_vm6 = vcmp.ge.f32.partialorder %v156_v47, 0.0  ;;  %v201_v48 = vmul.f32 0.01, %v156_v47 }
 0x10c   :  { %v203_v49 = vsel %vm199_vm6, %v156_v47, %v201_v48 }
 0x10d   :  { %207 = vrot.lane.b32.xlu0 %v203_v49, %s690_s10 }
 0x10f   :  { %v158_v50 = vpop.f32.mrf.mxu3  ;;  %v188_v54 = vpop.permute.xlu2 %187 }
 0x110   :  { %v159_v51 = vadd.f32 %v556_v30, %v158_v50  ;;  %v196_v56 = vmul.f32 %v559_v52, %v188_v54 }
 0x112   :  { %vm200_vm7 = vcmp.ge.f32.partialorder %v159_v51, 0.0  ;;  %v202_v53 = vmul.f32 0.01, %v159_v51  ;;  %v247_v57 = vmul.f32 %v196_v56, %v196_v56  ;;  %566 = vtanh.f32 %v159_v51 }
 0x113   :  { %568 = vtanh.f32 %v156_v47  ;;  %v251_v27 = vsel %vm241_vm8, %v196_v56, 0.0 }
 0x114   :  { %v204_v55 = vsel %vm200_vm7, %v159_v51, %v202_v53 }
 0x115   :  { %209 = vrot.lane.b32.xlu2 %v204_v55, %s690_s10 }
 0x117   :  { %v186_v62 = vpop.permute.xlu2 %185 }
 0x118   :  { %v195_v0 = vmul.f32 %v563_v63, %v186_v62  ;;  %v567_v6 = vpop.eup %566 }
 0x119   :  { %v569_v11 = vpop.eup %568 }
 0x11a   :  { %v246_v4 = vmul.f32 %v195_v0, %v195_v0  ;;  %v250_v28 = vsel %vm241_vm8, %v195_v0, 0.0 }
 0x11d   :  { %262 = vrot.lane.b32.xlu2 %v247_v57, %s691_s4 }
 0x127   :  { %v184_v59 = vpop.permute.xlu1 %183 }
 0x128   :  { %v194_v60 = vmul.f32 %v561_v58, %v184_v59 }
 0x12a   :  { %v245_v61 = vmul.f32 %v194_v60, %v194_v60  ;;  %v249_v21 = vsel %vm241_vm8, %v194_v60, 0.0 }
 0x12c   :  { %258 = vrot.lane.b32.xlu0 %v245_v61, %s691_s4 }
 0x12f   :  { %v182_v2 = vpop.permute.xlu1 %181 }
 0x130   :  { %v193_v3 = vmul.f32 %v565_v1, %v182_v2 }
 0x132   :  { %v244_v5 = vmul.f32 %v193_v3, %v193_v3  ;;  %v248_v23 = vsel %vm241_vm8, %v193_v3, 0.0 }
 0x134   :  { %260 = vrot.lane.b32.xlu0 %v246_v4, %s691_s4  ;;  %256 = vrot.lane.b32.xlu1 %v244_v5, %s691_s4 }
 0x137   :  { %v219_v8 = vpop.permute.xlu1 %218 }
 0x16f   :  { %v210_v7 = vpop.permute.xlu2 %209 }
 0x170   :  { %v214_v9 = vmul.f32 %v567_v6, %v210_v7 }
 0x172   :  { %v222_v10 = vmul.f32 %v219_v8, %v214_v9  ;;  %v224_v16 = vmul.f32 %v214_v9, %v214_v9 }
 0x174   :  { %229 = vrot.lane.b32.xlu0 %v222_v10, %s689_s0 }
 0x177   :  { %v263_v22 = vpop.permute.xlu2 %262 }
 0x178   :  { %v271_v24 = vsel %vm241_vm8, 0.0, %v263_v22 }
 0x17f   :  { %v208_v12 = vpop.permute.xlu0 %207 }
 0x180   :  { %v213_v13 = vmul.f32 %v569_v11, %v208_v12 }
 0x182   :  { %v221_v14 = vmul.f32 %v219_v8, %v213_v13  ;;  %v223_v15 = vmul.f32 %v213_v13, %v213_v13 }
 0x184   :  { %235 = vrot.lane.b32.xlu2 %v223_v15, %s690_s10  ;;  %227 = vrot.lane.b32.xlu1 %v221_v14, %s689_s0 }
 0x18c   :  { %237 = vrot.lane.b32.xlu1 %v224_v16, %s690_s10 }
 0x19e   :  { %v259_v17 = vpop.permute.xlu0 %258 }
 0x19f   :  { %v269_v18 = vsel %vm241_vm8, 0.0, %v259_v17 }
 0x1a0   :  { %505 = vmatpush.xpose.msk.msra.mxu2 %vm74_vm0, %v269_v18 }
 0x1a6   :  { %v257_v19 = vpop.permute.xlu1 %256  ;;  %v261_v25 = vpop.permute.xlu0 %260 }
 0x1a7   :  { %v268_v20 = vsel %vm241_vm8, 0.0, %v257_v19  ;;  %v270_v26 = vsel %vm241_vm8, 0.0, %v261_v25 }
 0x1a8   :  { %506 = vmatpush.xpose.msk.msra.mxu2 %vm74_vm0, %v268_v20 }
 0x1ac   :  { %507 = vmatpush.xpose.msk.msra.mxu2 %vm74_vm0, %v249_v21 }
 0x1b0   :  { %508 = vmatpush.xpose.msk.msra.mxu2 %vm74_vm0, %v248_v23 }
 0x1b4   :  { %510 = vmatpush.xpose.msk.msrb.mxu2 %vm74_vm0, %v271_v24 }
 0x1b8   :  { %511 = vmatpush.xpose.msk.msrb.mxu2 %vm74_vm0, %v270_v26 }
 0x1bc   :  { %512 = vmatpush.xpose.msk.msrb.mxu2 %vm74_vm0, %v251_v27 }
 0x1c0   :  { %513 = vmatpush.xpose.msk.msrb.mxu2 %vm74_vm0, %v250_v28 }
 0x1de   :  { %v236_v29 = vpop.permute.xlu2 %235 }
 0x1e6   :  { %v230_v32 = vpop.permute.xlu0 %229 }
 0x1f6   :  { %v228_v30 = vpop.permute.xlu1 %227 }
 0x1f7   :  { %v242_v31 = vsel %vm241_vm8, %v228_v30, %v236_v29 }
 0x1f8   :  { %509 = vmatmul.msk.f32.vlgmr.msra.gmra.mxu2 %vm74_vm0, %v242_v31 }
 0x1fe   :  { %v238_v33 = vpop.permute.xlu1 %237 }
 0x1ff   :  { %v243_v34 = vsel %vm241_vm8, %v230_v32, %v238_v33 }
 0x200   :  { %514 = vmatmul.msk.f32.vlgmr.msrb.gmra.mxu2 %vm74_vm0, %v243_v34 }
 0x27b   :  { %v304_v35 = vpop.f32.mrf.mxu2 }
 0x27c   :  { %v342_v36 = vmax.f32 %v304_v35, 1e-24 }
 0x27e   :  { %570 = vrsqrt.f32 %v342_v36  ;;  %vm350_vm10 = vweird.f32 %v342_v36 }
 0x283   :  { %v339_v37 = vpop.f32.mrf.mxu2 }
 0x284   :  { %v571_v38 = vpop.eup %570  ;;  %v343_v39 = vmax.f32 %v339_v37, 1e-24 }
 0x285   :  { %v345_v40 = vmul.f32 %v571_v38, %v342_v36  ;;  %vm351_vm9 = vweird.f32 %v571_v38 }
 0x286   :  { %572 = vrsqrt.f32 %v343_v39  ;;  %vm352_vm11 = vmor %vm350_vm10, %vm351_vm9  ;;  %vm360_vm13 = vweird.f32 %v343_v39 }
 0x287   :  { %v346_v41 = vmul.f32 %v571_v38, %v345_v40 }
 0x289   :  { %v347_v42 = vmul.f32 0.5, %v346_v41 }
 0x28b   :  { %v348_v43 = vsub.f32 1.5, %v347_v42 }
 0x28c   :  { %v573_v44 = vpop.eup %572 }
 0x28d   :  { %v355_v45 = vmul.f32 %v573_v44, %v343_v39  ;;  %v349_v46 = vmul.f32 %v571_v38, %v348_v43  ;;  %vm361_vm12 = vweird.f32 %v573_v44 }
 0x28e   :  { %vm362_vm14 = vmor %vm360_vm13, %vm361_vm12  ;;  %vm472_vm12 = vcmask 392192   ;;  %vm475_vm13 = vcmask 654336  }
 0x28f   :  { %v356_v47 = vmul.f32 %v573_v44, %v355_v45  ;;  %v353_v48 = vsel %vm352_vm11, %v571_v38, %v349_v46  ;;  %vm426_vm11 = vcmask 1041409  }
 0x290   :  { %366 = vrot.lane.b32.xlu2 %v353_v48, %s692_s12 }
 0x291   :  { %v357_v49 = vmul.f32 0.5, %v356_v47 }
 0x293   :  { %v358_v50 = vsub.f32 1.5, %v357_v49 }
 0x295   :  { %v359_v51 = vmul.f32 %v573_v44, %v358_v50 }
 0x297   :  { %v363_v52 = vsel %vm362_vm14, %v573_v44, %v359_v51  ;;  %vm477_vm14 = vcmask 785408  }
 0x298   :  { %368 = vrot.lane.b32.xlu0 %v363_v52, %s692_s12 }
 0x2ea   :  { %v367_v53 = vpop.permute.xlu2 %366 }
 0x2eb   :  { %v372_v54 = vmul.f32 %v367_v53, %v304_v35 }
 0x2ed   :  { %v375_v55 = vsel %vm374_vm15, %v372_v54, -inf }
 0x2ee   :  { %376 = vmax.xlane.f32.xlu1 %v375_v55 }
 0x30a   :  { %v369_v56 = vpop.permute.xlu0 %368 }
 0x30b   :  { %v373_v57 = vmul.f32 %v369_v56, %v339_v37 }
 0x30d   :  { %v378_v58 = vsel %vm374_vm15, %v373_v57, -inf }
 0x30e   :  { %379 = vmax.xlane.f32.xlu2 %v378_v58 }
 0x361   :  { %v377_v59 = vpop.xlane.xlu1 %376 }
 0x362   :  { %v381_v60 = vsub.f32 %v372_v54, %v377_v59 }
 0x364   :  { %v383_v61 = vmul.f32 1.442695, %v381_v60 }
 0x366   :  { %574 = vpow2.f32 %v383_v61 }
 0x36c   :  { %v575_v62 = vpop.eup %574 }
 0x36d   :  { %v387_v63 = vsel %vm374_vm15, %v575_v62, 0.0 }
 0x36e   :  { %388 = vadd.xlane.f32.xlu0 %v387_v63 }
 0x381   :  { %v380_v0 = vpop.xlane.xlu2 %379 }
 0x382   :  { %v382_v1 = vsub.f32 %v373_v57, %v380_v0 }
 0x384   :  { %v385_v2 = vmul.f32 1.442695, %v382_v1 }
 0x386   :  { %576 = vpow2.f32 %v385_v2 }
 0x38c   :  { %v577_v3 = vpop.eup %576 }
 0x38d   :  { %v390_v4 = vsel %vm374_vm15, %v577_v3, 0.0 }
 0x38e   :  { %391 = vadd.xlane.f32.xlu2 %v390_v4 }
 0x3e1   :  { %v389_v5 = vpop.xlane.xlu0 %388 }
 0x3e2   :  { %578 = vrcp.f32 %v389_v5  ;;  %v404_v12 = vand.u32 2147483648, %v389_v5  ;;  %vm398_vm3 = vweird.f32 %v389_v5  ;;  %v402_v13 = vand.u32 2147483647, %v389_v5 }
 0x3e4   :  { %v405_v17 = vor.u32 1.1754944e-38, %v404_v12  ;;  %vm403_vm5 = vcmp.eq.f32.partialorder %v402_v13, 8.507059e+37 }
 0x3e8   :  { %v579_v6 = vpop.eup %578 }
 0x3e9   :  { %v394_v7 = vmul.f32 %v579_v6, %v389_v5  ;;  %vm399_vm2 = vweird.f32 %v579_v6 }
 0x3ea   :  { %vm400_vm4 = vmor %vm398_vm3, %vm399_vm2 }
 0x3eb   :  { %v395_v8 = vsub.f32 1.0, %v394_v7 }
 0x3ed   :  { %v396_v9 = vmul.f32 %v579_v6, %v395_v8 }
 0x3ef   :  { %v397_v11 = vadd.f32 %v579_v6, %v396_v9 }
 0x3f1   :  { %v401_v15 = vsel %vm400_vm4, %v579_v6, %v397_v11 }
 0x3f2   :  { %v406_v19 = vsel %vm403_vm5, %v405_v17, %v401_v15 }
 0x3f3   :  { %v421_v23 = vmul.f32 %v575_v62, %v406_v19 }
 0x3f5   :  { %v429_v29 = vrot.slane %v421_v23, 1  ;;  %v440_v30 = vrot.slane %v421_v23, 3  ;;  %v434_v33 = vrot.slane %v421_v23, 2  ;;  %v446_v40 = vrot.slane %v421_v23, 4 }
 0x3f6   :  { %v452_v44 = vrot.slane %v421_v23, 5  ;;  %v458_v45 = vrot.slane %v421_v23, 6  ;;  %v464_v49 = vrot.slane %v421_v23, 7 }
 0x401   :  { %v392_v10 = vpop.xlane.xlu2 %391 }
 0x402   :  { %580 = vrcp.f32 %v392_v10  ;;  %v418_v20 = vand.u32 2147483648, %v392_v10  ;;  %v416_v22 = vand.u32 2147483647, %v392_v10  ;;  %vm412_vm7 = vweird.f32 %v392_v10 }
 0x404   :  { %v419_v25 = vor.u32 1.1754944e-38, %v418_v20  ;;  %vm417_vm10 = vcmp.eq.f32.partialorder %v416_v22, 8.507059e+37 }
 0x408   :  { %v581_v14 = vpop.eup %580 }
 0x409   :  { %v408_v16 = vmul.f32 %v581_v14, %v392_v10  ;;  %vm413_vm6 = vweird.f32 %v581_v14 }
 0x40a   :  { %vm414_vm9 = vmor %vm412_vm7, %vm413_vm6 }
 0x40b   :  { %v409_v18 = vsub.f32 1.0, %v408_v16 }
 0x40d   :  { %v410_v21 = vmul.f32 %v581_v14, %v409_v18 }
 0x40f   :  { %v411_v24 = vadd.f32 %v581_v14, %v410_v21 }
 0x411   :  { %v415_v26 = vsel %vm414_vm9, %v581_v14, %v411_v24 }
 0x412   :  { %v420_v27 = vsel %vm417_vm10, %v419_v25, %v415_v26 }
 0x413   :  { %v422_v28 = vmul.f32 %v577_v3, %v420_v27 }
 0x415   :  { %v430_v31 = vsel %vm426_vm11, %v422_v28, %v429_v29  ;;  %v441_v32 = vrot.slane %v422_v28, 2  ;;  %v435_v34 = vrot.slane %v422_v28, 1  ;;  %v425_v35 = vrot.slane %v422_v28, 7 }
 0x416   :  { %431 = vrot.lane.b32.xlu1 %v430_v31, %s693_s13  ;;  %v447_v38 = vrot.slane %v422_v28, 3  ;;  %v453_v41 = vrot.slane %v422_v28, 4  ;;  %v459_v42 = vrot.slane %v422_v28, 5  ;;  %v465_v48 = vrot.slane %v422_v28, 6 }
 0x417   :  { %v442_v36 = vsel %vm426_vm11, %v441_v32, %v440_v30  ;;  %v436_v37 = vsel %vm426_vm11, %v435_v34, %v434_v33  ;;  %v427_v39 = vsel %vm426_vm11, %v425_v35, %v421_v23 }
 0x418   :  { %443 = vrot.lane.b32.xlu0 %v442_v36, %s694_s14  ;;  %437 = vrot.lane.b32.xlu2 %v436_v37, %s691_s4  ;;  %v448_v43 = vsel %vm426_vm11, %v447_v38, %v446_v40  ;;  %v454_v46 = vsel %vm426_vm11, %v453_v41, %v452_v44  ;;  %v460_v47 = vsel %vm426_vm11, %v459_v42, %v458_v45 }
 0x419   :  { %v466_v50 = vsel %vm426_vm11, %v465_v48, %v464_v49 }
 0x41e   :  { %449 = vrot.lane.b32.xlu1 %v448_v43, %s689_s0 }
 0x420   :  { %455 = vrot.lane.b32.xlu0 %v454_v46, %s695_s15  ;;  %461 = vrot.lane.b32.xlu2 %v460_v47, %s690_s10 }
 0x426   :  { %467 = vrot.lane.b32.xlu1 %v466_v50, %s692_s12 }
 0x472   :  { %v438_v54 = vpop.permute.xlu2 %437 }
 0x47a   :  { %v462_v61 = vpop.permute.xlu2 %461 }
 0x488   :  { %v432_v51 = vpop.permute.xlu1 %431 }
 0x489   :  { %v470_v53 = vsel %vm374_vm15, %v427_v39, %v432_v51 }
 0x48a   :  { %v444_v52 = vpop.permute.xlu0 %443  ;;  %v471_v55 = vsel %vm241_vm8, %v470_v53, %v438_v54 }
 0x48b   :  { %v473_v57 = vsel %vm472_vm12, %v471_v55, %v444_v52 }
 0x490   :  { %v450_v56 = vpop.permute.xlu1 %449 }
 0x491   :  { %v474_v58 = vsel %vm74_vm0, %v473_v57, %v450_v56 }
 0x492   :  { %v456_v59 = vpop.permute.xlu0 %455 }
 0x493   :  { %v476_v60 = vsel %vm475_vm13, %v474_v58, %v456_v59 }
 0x494   :  { %v478_v63 = vsel %vm477_vm14, %v476_v60, %v462_v61 }
 0x498   :  { %v468_v62 = vpop.permute.xlu1 %467 }
 0x499   :  { %v479_v0 = vsel %vm107_vm1, %v478_v63, %v468_v62 }
 0x49a   :  { %480 = vst [vmem:[#allocation8] sm:$0x3] %v479_v0 }
 0x49b   :  { %491 = dma.vmem_to_hbm [thread:$0]  %s487_s17, 32, %s489_s20, [#allocation4]  }
 0x49c   :  { %682 = dma.done.wait [#allocation4], 32  }
 0x49d   :  { %683 = vsyncadd [#allocation4], 4294967264 }
 0x49e   :  { %496 = vsyncpa [#allocation3], 1 }
 0x49f   :  { %497 = vsyncpa [#allocation6], 1 }
 0x4a0   :  { %498 = vsyncpa [#allocation4], 1 }

</bundles_post_ra>
